<compile_context>
chip_gen: v7x
topology: tpu7x:2x2x1
jax: 0.10.0
libtpu: 0.0.40
codegen_flags: <defaults>
</compile_context>

<pallas_src>
import jax
import jax.numpy as jnp
from jax import lax
from jax.experimental import pallas as pl
from jax.experimental.pallas import tpu as pltpu


def _round_up(n, m):
    return ((n + m - 1) // m) * m


# Packed-parameter layout.
#   WPACK (bf16, [176, 64]): layers 1..6 weights, [out, in] blocks at
#     16-aligned row offsets (bf16 sublane packing), zero elsewhere.
#   BPACK (f32,  [192, 1]) : biases b1..b6 at the same row offsets, b7 at
#     row 168, and W7 transposed ([8, 1]) at rows 176:184.
_W_LAYOUT = ((0, 16, 6), (16, 32, 16), (48, 64, 32),
             (112, 32, 64), (144, 16, 32), (160, 8, 16))  # (row_off, out, in)
_WPACK_SHAPE = (176, 64)
_BPACK_SHAPE = (192, 1)
_B7_ROW = 168
_W7_ROW = 176


def basenet_kernel(x_ref, wp_ref, bp_ref, out_ref):
    """Fused MLP forward. x_ref: [b_tile, 6] f32 (native layout),
    activations are kept as [features, b_tile] (batch on the lane axis)."""
    # --- Layer 1 (6 -> 16): contract the feature axis of W1 and x directly,
    # producing [16, b_tile]; f32 operands (tiny contraction, robust path).
    off, out_d, in_d = _W_LAYOUT[0]
    w1 = wp_ref[off:off + out_d, 0:in_d].astype(jnp.float32)      # [16, 6]
    h = lax.dot_general(w1, x_ref[...], (((1,), (1,)), ((), ())),
                        preferred_element_type=jnp.float32)        # [16, bT]
    h = jnp.maximum(h + bp_ref[off:off + out_d, :], 0.0)

    # --- Layers 2..6: canonical [out,in] @ [in, b_tile] MXU matmuls,
    # bf16 operands, f32 accumulation; bias + ReLU in f32 on the VPU.
    for off, out_d, in_d in _W_LAYOUT[1:]:
        w = wp_ref[off:off + out_d, 0:in_d]                        # bf16
        acc = jnp.dot(w, h.astype(jnp.bfloat16),
                      preferred_element_type=jnp.float32)
        h = jnp.maximum(acc + bp_ref[off:off + out_d, :], 0.0)

    # --- Layer 7 (8 -> 1): off the MXU — VPU multiply + 8-sublane reduction.
    w7 = bp_ref[_W7_ROW:_W7_ROW + 8, :]                            # [8, 1] f32
    b7 = bp_ref[_B7_ROW:_B7_ROW + 1, :]                            # [1, 1] f32
    out_ref[...] = jnp.sum(h * w7, axis=0, keepdims=True) + b7     # [1, bT]


def pack_params(params):
    """Pack 7 (W[out, in], b[out]) pairs (PyTorch nn.Linear layout) into
    (wpack bf16 [176,64], bpack f32 [192,1])."""
    wpack = jnp.zeros(_WPACK_SHAPE, jnp.float32)
    bpack = jnp.zeros(_BPACK_SHAPE, jnp.float32)
    for (off, out_d, in_d), (w, b) in zip(_W_LAYOUT, params[:6]):
        wpack = wpack.at[off:off + out_d, 0:in_d].set(w.astype(jnp.float32))
        bpack = bpack.at[off:off + out_d, 0].set(b.astype(jnp.float32))
    w7, b7 = params[6]
    bpack = bpack.at[_B7_ROW, 0].set(b7.astype(jnp.float32)[0])
    bpack = bpack.at[_W7_ROW:_W7_ROW + 8, 0].set(w7.astype(jnp.float32)[0, :])
    return wpack.astype(jnp.bfloat16), bpack


def basenet_forward(x, packed, *, block_b=16384):
    """x: [B, 6] float. packed: (wpack, bpack) from pack_params.
    Returns [B, 1] float32."""
    wpack, bpack = packed
    B = x.shape[0]
    xr = x.astype(jnp.float32)
    if B < 128:
        # Tiny batches only: pad rows to one full 128-lane tile (cheap).
        xr = jnp.pad(xr, ((0, 128 - B), (0, 0)))
    nrows = xr.shape[0]

    # Batch tile: multiple of 128 lanes. Keep >= 2 grid steps when the batch
    # allows (v7x shards the parallel axis across both TensorCores); cap at
    # block_b (16K cols -> ~30 MiB peak VMEM incl. double-buffered x blocks).
    if nrows > 128:
        half = _round_up((nrows + 1) // 2, 128)
        b_tile = max(128, min(block_b, half))
    else:
        b_tile = 128
    grid_len = -(-nrows // b_tile)   # ragged tail handled by Pallas masking

    x_spec = pl.BlockSpec((b_tile, 6), lambda i: (i, 0))
    # Packed params: whole-array blocks with constant index_map -> fetched
    # once, VMEM-resident across all grid steps.
    wp_spec = pl.BlockSpec(_WPACK_SHAPE, lambda i: (0, 0))
    bp_spec = pl.BlockSpec(_BPACK_SHAPE, lambda i: (0, 0))
    out_spec = pl.BlockSpec((1, b_tile), lambda i: (0, i))

    out = pl.pallas_call(
        basenet_kernel,
        out_shape=jax.ShapeDtypeStruct((1, grid_len * b_tile), jnp.float32),
        grid=(grid_len,),
        in_specs=[x_spec, wp_spec, bp_spec],
        out_specs=out_spec,
        compiler_params=pltpu.CompilerParams(
            dimension_semantics=("parallel",),
            vmem_limit_bytes=48 * 1024 * 1024),
    )(xr, wpack, bpack)

    # Drop batch padding / ragged tail, return in PyTorch [B, 1] orientation.
    return out[:, :B].T


def init_params(key):
    """Deterministic init matching nn.Linear (weights [out, in], bias [out])."""
    dims = [6, 16, 32, 64, 32, 16, 8, 1]
    params = []
    for i in range(len(dims) - 1):
        fan_in, fan_out = dims[i], dims[i + 1]
        key, kw, kb = jax.random.split(key, 3)
        bound = 1.0 / (fan_in ** 0.5)
        w = jax.random.uniform(kw, (fan_out, fan_in), jnp.float32,
                               minval=-bound, maxval=bound)
        b = jax.random.uniform(kb, (fan_out,), jnp.float32,
                               minval=-bound, maxval=bound)
        params.append((w, b))
    return params


def reference_forward(x, params):
    h = x.astype(jnp.float32)
    for i, (w, b) in enumerate(params):
        h = h @ w.T + b
        if i < len(params) - 1:
            h = jnp.maximum(h, 0.0)
    return h


if __name__ == "__main__":
    key = jax.random.PRNGKey(0)
    key, kx1, kx2 = jax.random.split(key, 3)
    params = init_params(key)
    packed = pack_params(params)

    # Small module-consistent batch, plus a non-tile-multiple batch to
    # exercise the multi-step grid and the masked ragged tail.
    for B, kx in ((8, kx1), (300, kx2)):
        x = jax.random.normal(kx, (B, 6), dtype=jnp.float32)
        out = jax.block_until_ready(basenet_forward(x, packed))
        ref = reference_forward(x, params)
        assert out.shape == (B, 1), out.shape
        err = float(jnp.max(jnp.abs(out - ref)))
        # bf16 matmul operands -> ~1e-3 abs error vs the f32 reference.
        assert err < 5e-2, f"max abs error {err} vs reference at B={B}"

    print("KERNEL_OK")
</pallas_src>

<mosaic_0001>
module attributes {stable_mosaic.version = 11 : i64} {
  func.func @basenet_kernel(%arg0: i32, %arg1: memref<128x6xf32, #tpu.memory_space<vmem>>, %arg2: memref<176x64xbf16, #tpu.memory_space<vmem>>, %arg3: memref<192x1xf32, #tpu.memory_space<vmem>>, %arg4: memref<1x128xf32, #tpu.memory_space<vmem>>) attributes {dimension_semantics = [#tpu.dimension_semantics<parallel>], iteration_bounds = array<i64: 1>, scalar_prefetch = 0 : i64, scratch_operands = 0 : i64, tpu.core_type = #tpu.core_type<tc>, window_params = [{transform_indices = @transform_0, window_bounds = array<i64: 128, 6>}, {pipeline_mode = #tpu.pipeline_mode<synchronous>, transform_indices = @transform_1, window_bounds = array<i64: 176, 64>}, {pipeline_mode = #tpu.pipeline_mode<synchronous>, transform_indices = @transform_2, window_bounds = array<i64: 192, 1>}, {transform_indices = @transform_3, window_bounds = array<i64: 1, 128>}]} {
    %c0 = arith.constant 0 : index
    %c0_0 = arith.constant 0 : index
    %0 = vector.load %arg2[%c0, %c0_0] : memref<176x64xbf16, #tpu.memory_space<vmem>>, vector<16x6xbf16>
    %1 = arith.extf %0 : vector<16x6xbf16> to vector<16x6xf32>
    %c0_1 = arith.constant 0 : index
    %c0_2 = arith.constant 0 : index
    %2 = vector.load %arg1[%c0_1, %c0_2] : memref<128x6xf32, #tpu.memory_space<vmem>>, vector<128x6xf32>
    %cst = arith.constant dense<0.000000e+00> : vector<16x128xf32>
    %3 = tpu.matmul %1, %2, %cst {dimension_numbers = #tpu.dot_dimension_numbers<[1], [1], [0], [0], [0, 0, 1, 0], [], []>} : vector<16x6xf32>, vector<128x6xf32>, vector<16x128xf32> -> vector<16x128xf32>
    %c0_3 = arith.constant 0 : index
    %c0_4 = arith.constant 0 : index
    %4 = vector.load %arg3[%c0_3, %c0_4] : memref<192x1xf32, #tpu.memory_space<vmem>>, vector<16x1xf32>
    %5 = vector.broadcast %4 : vector<16x1xf32> to vector<16x128xf32>
    %6 = arith.addf %3, %5 : vector<16x128xf32>
    %cst_5 = arith.constant 0.000000e+00 : f32
    %7 = vector.broadcast %cst_5 : f32 to vector<16x128xf32>
    %8 = arith.maximumf %6, %7 : vector<16x128xf32>
    %c16 = arith.constant 16 : index
    %c0_6 = arith.constant 0 : index
    %9 = vector.load %arg2[%c16, %c0_6] : memref<176x64xbf16, #tpu.memory_space<vmem>>, vector<32x16xbf16>
    %10 = arith.truncf %8 : vector<16x128xf32> to vector<16x128xbf16>
    %cst_7 = arith.constant dense<0.000000e+00> : vector<32x128xf32>
    %11 = tpu.matmul %9, %10, %cst_7 {dimension_numbers = #tpu.dot_dimension_numbers<[1], [0], [0], [1], [0, 0, 1, 1], [], []>} : vector<32x16xbf16>, vector<16x128xbf16>, vector<32x128xf32> -> vector<32x128xf32>
    %c16_8 = arith.constant 16 : index
    %c0_9 = arith.constant 0 : index
    %12 = vector.load %arg3[%c16_8, %c0_9] : memref<192x1xf32, #tpu.memory_space<vmem>>, vector<32x1xf32>
    %13 = vector.broadcast %12 : vector<32x1xf32> to vector<32x128xf32>
    %14 = arith.addf %11, %13 : vector<32x128xf32>
    %cst_10 = arith.constant 0.000000e+00 : f32
    %15 = vector.broadcast %cst_10 : f32 to vector<32x128xf32>
    %16 = arith.maximumf %14, %15 : vector<32x128xf32>
    %c48 = arith.constant 48 : index
    %c0_11 = arith.constant 0 : index
    %17 = vector.load %arg2[%c48, %c0_11] : memref<176x64xbf16, #tpu.memory_space<vmem>>, vector<64x32xbf16>
    %18 = arith.truncf %16 : vector<32x128xf32> to vector<32x128xbf16>
    %cst_12 = arith.constant dense<0.000000e+00> : vector<64x128xf32>
    %19 = tpu.matmul %17, %18, %cst_12 {dimension_numbers = #tpu.dot_dimension_numbers<[1], [0], [0], [1], [0, 0, 1, 1], [], []>} : vector<64x32xbf16>, vector<32x128xbf16>, vector<64x128xf32> -> vector<64x128xf32>
    %c48_13 = arith.constant 48 : index
    %c0_14 = arith.constant 0 : index
    %20 = vector.load %arg3[%c48_13, %c0_14] : memref<192x1xf32, #tpu.memory_space<vmem>>, vector<64x1xf32>
    %21 = vector.broadcast %20 : vector<64x1xf32> to vector<64x128xf32>
    %22 = arith.addf %19, %21 : vector<64x128xf32>
    %cst_15 = arith.constant 0.000000e+00 : f32
    %23 = vector.broadcast %cst_15 : f32 to vector<64x128xf32>
    %24 = arith.maximumf %22, %23 : vector<64x128xf32>
    %c112 = arith.constant 112 : index
    %c0_16 = arith.constant 0 : index
    %25 = vector.load %arg2[%c112, %c0_16] : memref<176x64xbf16, #tpu.memory_space<vmem>>, vector<32x64xbf16>
    %26 = arith.truncf %24 : vector<64x128xf32> to vector<64x128xbf16>
    %cst_17 = arith.constant dense<0.000000e+00> : vector<32x128xf32>
    %27 = tpu.matmul %25, %26, %cst_17 {dimension_numbers = #tpu.dot_dimension_numbers<[1], [0], [0], [1], [0, 0, 1, 1], [], []>} : vector<32x64xbf16>, vector<64x128xbf16>, vector<32x128xf32> -> vector<32x128xf32>
    %c112_18 = arith.constant 112 : index
    %c0_19 = arith.constant 0 : index
    %28 = vector.load %arg3[%c112_18, %c0_19] : memref<192x1xf32, #tpu.memory_space<vmem>>, vector<32x1xf32>
    %29 = vector.broadcast %28 : vector<32x1xf32> to vector<32x128xf32>
    %30 = arith.addf %27, %29 : vector<32x128xf32>
    %cst_20 = arith.constant 0.000000e+00 : f32
    %31 = vector.broadcast %cst_20 : f32 to vector<32x128xf32>
    %32 = arith.maximumf %30, %31 : vector<32x128xf32>
    %c144 = arith.constant 144 : index
    %c0_21 = arith.constant 0 : index
    %33 = vector.load %arg2[%c144, %c0_21] : memref<176x64xbf16, #tpu.memory_space<vmem>>, vector<16x32xbf16>
    %34 = arith.truncf %32 : vector<32x128xf32> to vector<32x128xbf16>
    %cst_22 = arith.constant dense<0.000000e+00> : vector<16x128xf32>
    %35 = tpu.matmul %33, %34, %cst_22 {dimension_numbers = #tpu.dot_dimension_numbers<[1], [0], [0], [1], [0, 0, 1, 1], [], []>} : vector<16x32xbf16>, vector<32x128xbf16>, vector<16x128xf32> -> vector<16x128xf32>
    %c144_23 = arith.constant 144 : index
    %c0_24 = arith.constant 0 : index
    %36 = vector.load %arg3[%c144_23, %c0_24] : memref<192x1xf32, #tpu.memory_space<vmem>>, vector<16x1xf32>
    %37 = vector.broadcast %36 : vector<16x1xf32> to vector<16x128xf32>
    %38 = arith.addf %35, %37 : vector<16x128xf32>
    %cst_25 = arith.constant 0.000000e+00 : f32
    %39 = vector.broadcast %cst_25 : f32 to vector<16x128xf32>
    %40 = arith.maximumf %38, %39 : vector<16x128xf32>
    %c160 = arith.constant 160 : index
    %c0_26 = arith.constant 0 : index
    %41 = vector.load %arg2[%c160, %c0_26] : memref<176x64xbf16, #tpu.memory_space<vmem>>, vector<8x16xbf16>
    %42 = arith.truncf %40 : vector<16x128xf32> to vector<16x128xbf16>
    %cst_27 = arith.constant dense<0.000000e+00> : vector<8x128xf32>
    %43 = tpu.matmul %41, %42, %cst_27 {dimension_numbers = #tpu.dot_dimension_numbers<[1], [0], [0], [1], [0, 0, 1, 1], [], []>} : vector<8x16xbf16>, vector<16x128xbf16>, vector<8x128xf32> -> vector<8x128xf32>
    %c160_28 = arith.constant 160 : index
    %c0_29 = arith.constant 0 : index
    %44 = vector.load %arg3[%c160_28, %c0_29] : memref<192x1xf32, #tpu.memory_space<vmem>>, vector<8x1xf32>
    %45 = vector.broadcast %44 : vector<8x1xf32> to vector<8x128xf32>
    %46 = arith.addf %43, %45 : vector<8x128xf32>
    %cst_30 = arith.constant 0.000000e+00 : f32
    %47 = vector.broadcast %cst_30 : f32 to vector<8x128xf32>
    %48 = arith.maximumf %46, %47 : vector<8x128xf32>
    %c176 = arith.constant 176 : index
    %c0_31 = arith.constant 0 : index
    %49 = vector.load %arg3[%c176, %c0_31] : memref<192x1xf32, #tpu.memory_space<vmem>>, vector<8x1xf32>
    %c168 = arith.constant 168 : index
    %c0_32 = arith.constant 0 : index
    %50 = vector.load %arg3[%c168, %c0_32] : memref<192x1xf32, #tpu.memory_space<vmem>>, vector<1x1xf32>
    %51 = vector.broadcast %49 : vector<8x1xf32> to vector<8x128xf32>
    %52 = arith.mulf %48, %51 : vector<8x128xf32>
    %cst_33 = arith.constant dense<0.000000e+00> : vector<128xf32>
    %53 = vector.multi_reduction <add>, %52, %cst_33 [0] : vector<8x128xf32> to vector<128xf32>
    %54 = vector.shape_cast %53 : vector<128xf32> to vector<1x128xf32>
    %55 = vector.broadcast %50 : vector<1x1xf32> to vector<1x128xf32>
    %56 = arith.addf %54, %55 : vector<1x128xf32>
    %c0_34 = arith.constant 0 : index
    %c0_35 = arith.constant 0 : index
    %57 = vector.load %arg4[%c0_34, %c0_35] : memref<1x128xf32, #tpu.memory_space<vmem>>, vector<1x128xf32>
    tpu.vector_store %arg4[%c0_34, %c0_35], %56 {strides = array<i32>} : memref<1x128xf32, #tpu.memory_space<vmem>>, vector<1x128xf32>,
    return
  }
  func.func @transform_0(%arg0: i32) -> (i32, i32) {
    %c0_i32 = arith.constant 0 : i32
    %c0_i32_0 = arith.constant 0 : i32
    return %arg0, %c0_i32 : i32, i32
  }
  func.func @transform_1(%arg0: i32) -> (i32, i32) {
    %c0_i32 = arith.constant 0 : i32
    %c0_i32_0 = arith.constant 0 : i32
    %c0_i32_1 = arith.constant 0 : i32
    return %c0_i32, %c0_i32_0 : i32, i32
  }
  func.func @transform_2(%arg0: i32) -> (i32, i32) {
    %c0_i32 = arith.constant 0 : i32
    %c0_i32_0 = arith.constant 0 : i32
    %c0_i32_1 = arith.constant 0 : i32
    return %c0_i32, %c0_i32_0 : i32, i32
  }
  func.func @transform_3(%arg0: i32) -> (i32, i32) {
    %c0_i32 = arith.constant 0 : i32
    %c0_i32_0 = arith.constant 0 : i32
    return %c0_i32, %arg0 : i32, i32
  }
}

</mosaic_0001>

<bundles_post_ra>
// kernel: tpu_custom_call.1
= control target key start
LH: loop header
LB: loop body
LE: loop exit
PB: predicated region body
PF: predicated region fallthrough
CT: control target
= control target key end

     0   :  { %vm48_vm0 = vcmask 48128   ;;  %v944_v6 = vmov 0   ;;  %s1182_s0 = inlined_call_operand.vmem [shape: f32[128,6], index: 0, kind: input, shape index: {}]   ;;  %s1183_s1 = inlined_call_operand.vmem [shape: bf16[176,64], index: 1, kind: input, shape index: {}]   ;;  %s1184_s2 = inlined_call_operand.vmem [shape: f32[192,1], index: 2, kind: input, shape index: {}]   ;;  %s1185_s3 = inlined_call_operand.hbm [shape: f32[1,128], index: 3, kind: output, shape index: {}]  }
   0x1   :  { %v20_v0 = vld [vmem:[%s1182_s0] sm:$0xff]  ;;  %v21_v1 = vld [vmem:[%s1182_s0 + $0x8] sm:$0xff]  ;;  %v22_v2 = vld [vmem:[%s1182_s0 + $0x10] sm:$0xff]  ;;  %909 = vset.pattern.permute.xlu0 %v944_v6  ;;  %910 = vset.pattern.permute.xlu1 %v944_v6 }
   0x2   :  { %v857_v3 = vpack.c.bf16 %v21_v1, %v20_v0  ;;  %vm979_vm1 = vmpackc.low %vm48_vm0, %vm48_vm0  ;;  %v23_v5 = vld [vmem:[%s1182_s0 + $0x18] sm:$0xff]  ;;  %v737_v8 = vld [vmem:[%s1183_s1] sm:$0xff]  }
   0x3   :  { %v863_v7 = vpack.c.bf16 %v23_v5, %v22_v2  ;;  %v24_v9 = vld [vmem:[%s1182_s0 + $0x20] sm:$0xff]  ;;  %v25_v10 = vld [vmem:[%s1182_s0 + $0x28] sm:$0xff]  ;;  %v738_v11 = vunpack.c.l.bf16 %v737_v8  ;;  %v26_v16 = vld [vmem:[%s1182_s0 + $0x30] sm:$0xff] }
   0x4   :  { %859 = vmatprep.subr.msk.bf16.mxu0 %vm979_vm1, %v857_v3  ;;  %v36_v12 = vld [vmem:[%s1184_s2] sm:$0xff]  ;;  %v37_v13 = vld [vmem:[%s1184_s2 + $0x8] sm:$0xff]  ;;  %v869_v14 = vpack.c.bf16 %v25_v10, %v24_v9  ;;  %v27_v17 = vld [vmem:[%s1182_s0 + $0x38] sm:$0xff] }
   0x5   :  { %862 = vmatpush3.bf16.xpose.msk.msra.mxu0 %vm979_vm1, %v857_v3  ;;  %40 = vperm.xlu0 %909, %v36_v12   ;;  %v187_v15 = vld [vmem:[%s1184_s2 + $0x20] sm:$0xff]  ;;  %v289_v18 = vld [vmem:[%s1184_s2 + $0x30] sm:$0xff] }
   0x6   :  { %865 = vmatprep.subr.msk.bf16.mxu0 %vm979_vm1, %v863_v7  ;;  %810 = vmatprep.mubr.msk.f32.mxu0 %vm48_vm0, %v738_v11 }
   0x9   :  { %45 = vperm.xlu0 %909, %v37_v13  }
   0xd   :  { %868 = vmatpush3.bf16.xpose.msk.msra.mxu0 %vm979_vm1, %v863_v7  ;;  %201 = vperm.xlu0 %909, %v187_v15  }
   0xe   :  { %871 = vmatprep.subr.msk.bf16.mxu0 %vm979_vm1, %v869_v14 }
   0xf   :  { %8 = vsyncpa [#allocation3], 0  ;;  %v875_v19 = vpack.c.bf16 %v27_v17, %v26_v16  ;;  %v291_v20 = vld [vmem:[%s1184_s2 + $0x40] sm:$0xff]  ;;  %v29_v22 = vld [vmem:[%s1182_s0 + $0x48] sm:$0xff]  ;;  %v739_v40 = vunpack.c.h.bf16 %v737_v8  ;;  %vm219_vm2 = vcmask 130048   ;;  %vm357_vm3 = vcmask 261120  }
  0x10   :  { %v28_v21 = vld [vmem:[%s1182_s0 + $0x40] sm:$0xff]  ;;  %v293_v23 = vld [vmem:[%s1184_s2 + $0x50] sm:$0xff]  ;;  %v31_v27 = vld [vmem:[%s1182_s0 + $0x58] sm:$0xff]  ;;  %vm485_vm4 = vcmask 523264   ;;  %vm946_vm5 = vmmov 0   ;;  %s947_s28 = smov [#allocation2]  }
  0x11   :  { %299 = vperm.xlu0 %909, %v289_v18   ;;  %v881_v24 = vpack.c.bf16 %v29_v22, %v28_v21  ;;  %v295_v25 = vld [vmem:[%s1184_s2 + $0x60] sm:$0xff]  ;;  %v30_v26 = vld [vmem:[%s1182_s0 + $0x50] sm:$0xff]  ;;  %v33_v32 = vld [vmem:[%s1182_s0 + $0x68] sm:$0xff]  ;;  %s691_s29 = sshll.u32 %s947_s28, 4  ;;  %s692_s29 = int_to_ptr.vmem [resolvable:$true] %s691_s29 }
  0x12   :  { %v451_v28 = vld [vmem:[%s1184_s2 + $0x70] sm:$0xff]  ;;  %v887_v29 = vpack.c.bf16 %v31_v27, %v30_v26  ;;  %v453_v30 = vld [vmem:[%s1184_s2 + $0x80] sm:$0xff]  ;;  %v35_v37 = vld [vmem:[%s1182_s0 + $0x78] sm:$0xff]  ;;  %s924_s30 = scalar_lea.vmem %s692_s29, 32  ;;  %p925_p1 = scmp.lt.s32.totalorder %s692_s29, %s692_s29 }
  0x13   :  { %v32_v31 = vld [vmem:[%s1182_s0 + $0x60] sm:$0xff]  ;;  %v549_v33 = vld [vmem:[%s1184_s2 + $0x90] sm:$0xff]  ;;  %v665_v38 = vld [vmem:[%s1184_s2 + $0xa8] sm:$0x1] }
  0x14   :  { %v893_v34 = vpack.c.bf16 %v33_v32, %v32_v31  ;;  %v614_v35 = vld [vmem:[%s1184_s2 + $0xa0] sm:$0xff]  ;;  %v34_v36 = vld [vmem:[%s1182_s0 + $0x70] sm:$0xff]  ;;  %v911_v41 = vld [vmem:[%s1183_s1 + $0x8] sm:$0xff]  }
  0x15   :  { %874 = vmatpush3.bf16.xpose.msk.msra.mxu0 %vm979_vm1, %v869_v14  ;;  %309 = vperm.xlu0 %909, %v291_v20   ;;  %v899_v39 = vpack.c.bf16 %v35_v37, %v34_v36  ;;  %v185_v42 = vld [vmem:[%s1184_s2 + $0x10] sm:$0xff]  ;;  %v186_v43 = vld [vmem:[%s1184_s2 + $0x18] sm:$0xff]  ;;  %v188_v44 = vld [vmem:[%s1184_s2 + $0x28] sm:$0xff] }
  0x16   :  { %877 = vmatprep.subr.msk.bf16.mxu0 %vm979_vm1, %v875_v19  ;;  %815 = vmatprep.mubr.msk.bf16.mxu1 %vm219_vm2, %v911_v41  ;;  %v290_v45 = vld [vmem:[%s1184_s2 + $0x38] sm:$0xff]  ;;  %v292_v46 = vld [vmem:[%s1184_s2 + $0x48] sm:$0xff]  ;;  %v664_v52 = vld [vmem:[%s1184_s2 + $0xb0] sm:$0xff] }
  0x17   :  { %191 = vperm.xlu1 %910, %v185_v42   ;;  %v294_v47 = vld [vmem:[%s1184_s2 + $0x58] sm:$0xff]  ;;  %v296_v48 = vld [vmem:[%s1184_s2 + $0x68] sm:$0xff]  ;;  %v912_v62 = vld [vmem:[%s1183_s1 + $0x10] sm:$0xff]  }
  0x18   :  { %v452_v49 = vld [vmem:[%s1184_s2 + $0x78] sm:$0xff]  ;;  %v454_v50 = vld [vmem:[%s1184_s2 + $0x88] sm:$0xff]  ;;  %v914_v18 = vld [vmem:[%s1183_s1 + $0x20] sm:$0xff]  }
  0x19   :  { %319 = vperm.xlu0 %909, %v293_v23   ;;  %v550_v51 = vld [vmem:[%s1184_s2 + $0x98] sm:$0xff]  ;;  %v916_v20 = vld [vmem:[%s1183_s1 + $0x30] sm:$0xff]  }
  0x1a   :  { %v913_v63 = vld [vmem:[%s1183_s1 + $0x18] sm:$0xff]  }
  0x1b   :  { %196 = vperm.xlu1 %910, %v186_v43   ;;  %v917_v21 = vld [vmem:[%s1183_s1 + $0x38] sm:$0xff]  }
  0x1d   :  { %880 = vmatpush3.bf16.xpose.msk.msra.mxu0 %vm979_vm1, %v875_v19  ;;  %329 = vperm.xlu0 %909, %v295_v25   ;;  %v915_v19 = vld [vmem:[%s1183_s1 + $0x28] sm:$0xff]  }
  0x1e   :  { %883 = vmatprep.subr.msk.bf16.mxu0 %vm979_vm1, %v881_v24 }
  0x1f   :  { %206 = vperm.xlu1 %910, %v188_v44  }
  0x21   :  { %457 = vperm.xlu0 %909, %v451_v28  }
  0x23   :  { %304 = vperm.xlu1 %910, %v290_v45  }
  0x25   :  { %886 = vmatpush3.bf16.xpose.msk.msra.mxu0 %vm979_vm1, %v881_v24  ;;  %467 = vperm.xlu0 %909, %v453_v30  }
  0x26   :  { %889 = vmatprep.subr.msk.bf16.mxu0 %vm979_vm1, %v887_v29 }
  0x27   :  { %314 = vperm.xlu1 %910, %v292_v46  }
  0x29   :  { %553 = vperm.xlu0 %909, %v549_v33  }
  0x2b   :  { %324 = vperm.xlu1 %910, %v294_v47  }
  0x2d   :  { %892 = vmatpush3.bf16.xpose.msk.msra.mxu0 %vm979_vm1, %v887_v29  ;;  %617 = vperm.xlu0 %909, %v614_v35  }
  0x2e   :  { %895 = vmatprep.subr.msk.bf16.mxu0 %vm979_vm1, %v893_v34 }
  0x2f   :  { %334 = vperm.xlu1 %910, %v296_v48  }
  0x31   :  { %680 = vperm.xlu0 %909, %v665_v38  }
  0x33   :  { %462 = vperm.xlu1 %910, %v452_v49  }
  0x35   :  { %898 = vmatpush3.bf16.xpose.msk.msra.mxu0 %vm979_vm1, %v893_v34 }
  0x36   :  { %901 = vmatprep.subr.msk.bf16.mxu0 %vm979_vm1, %v899_v39 }
  0x37   :  { %472 = vperm.xlu1 %910, %v454_v50  }
  0x3b   :  { %558 = vperm.xlu1 %910, %v550_v51  }
  0x3d   :  { %904 = vmatpush3.bf16.xpose.msk.msra.mxu0 %vm979_vm1, %v899_v39 }
  0x3f   :  { %668 = vperm.xlu1 %910, %v664_v52  }
  0x44   :  { %811 = vmatmul.mubr.msk.f32.vlgmr.msra.gmra.mrb[0].mxu0 %vm48_vm0, %v739_v40 }
  0x84   :  { %v41_v53 = vpop.permute.xlu0 %40 }
  0x88   :  { %v46_v54 = vpop.permute.xlu0 %45 }
  0x8c   :  { %v202_v2 = vpop.permute.xlu0 %201 }
  0x90   :  { %v300_v22 = vpop.permute.xlu0 %299 }
  0x94   :  { %v310_v24 = vpop.permute.xlu0 %309 }
  0x96   :  { %v192_v0 = vpop.permute.xlu1 %191 }
  0x98   :  { %v320_v29 = vpop.permute.xlu0 %319 }
  0x9a   :  { %v197_v1 = vpop.permute.xlu1 %196 }
  0x9c   :  { %v330_v41 = vpop.permute.xlu0 %329 }
  0x9e   :  { %v207_v6 = vpop.permute.xlu1 %206 }
  0xa2   :  { %v305_v23 = vpop.permute.xlu1 %304 }
  0xa6   :  { %v315_v25 = vpop.permute.xlu1 %314 }
  0xaa   :  { %v325_v34 = vpop.permute.xlu1 %324 }
  0xae   :  { %v335_v46 = vpop.permute.xlu1 %334 }
 0x117   :  { %v812_v55 = vpop.f32.mrb[0].mxu0 }
 0x118   :  { %v175_v56 = vadd.f32 %v812_v55, %v46_v54  ;;  %v169_v57 = vpop.f32.mrb[1].mxu0 }
 0x119   :  { %v170_v58 = vadd.f32 %v169_v57, %v41_v53 }
 0x11a   :  { %v179_v59 = vmax.f32 %v175_v56, 0.0 }
 0x11b   :  { %v178_v60 = vmax.f32 %v170_v58, 0.0  ;;  %v918_v58 = vld [vmem:[%s1183_s1 + $0x40] sm:$0xff]  }
 0x11d   :  { %v184_v61 = vpack.c.bf16 %v179_v59, %v178_v60  ;;  %v945_v59 = vmov 0.0   ;;  %v458_v60 = vpop.permute.xlu0 %457 }
 0x11f   :  { %813 = vmatprep.subr.bf16.mxu1 %v184_v61 }
 0x120   :  { %814 = vmatpush3.bf16.msra.mxu1 %v184_v61  ;;  %v463_v61 = vpop.permute.xlu1 %462 }
 0x123   :  { %816 = vmatmul.mubr.msk.bf16.vlgmr.msra.gmra.mrb[0].mxu1 %vm219_vm2, %v912_v62  ;;  %v468_v62 = vpop.permute.xlu0 %467 }
 0x124   :  { %823 = vmatprep.mubr.msk.bf16.mxu1 %vm357_vm3, %v913_v63 }
 0x1f6   :  { %v817_v3 = vpop.f32.mrb[0].mxu1 }
 0x1f7   :  { %v269_v4 = vadd.f32 %v817_v3, %v202_v2  ;;  %v260_v5 = vpop.f32.mrb[1].mxu1  ;;  %v473_v2 = vpop.permute.xlu1 %472 }
 0x1f8   :  { %v261_v7 = vadd.f32 %v260_v5, %v192_v0  ;;  %v818_v8 = vpop.f32.mrb[2].mxu1 }
 0x1f9   :  { %v272_v9 = vadd.f32 %v818_v8, %v207_v6  ;;  %v263_v10 = vpop.f32.mrb[3].mxu1  ;;  %v277_v12 = vmax.f32 %v269_v4, 0.0 }
 0x1fa   :  { %v264_v11 = vadd.f32 %v263_v10, %v197_v1  ;;  %v275_v14 = vmax.f32 %v261_v7, 0.0 }
 0x1fb   :  { %v278_v13 = vmax.f32 %v272_v9, 0.0 }
 0x1fc   :  { %v276_v15 = vmax.f32 %v264_v11, 0.0 }
 0x1fd   :  { %v288_v16 = vpack.c.bf16 %v278_v13, %v277_v12 }
 0x1fe   :  { %v287_v17 = vpack.c.bf16 %v276_v15, %v275_v14  ;;  %v919_v14 = vld [vmem:[%s1183_s1 + $0x48] sm:$0xff]   ;;  %v554_v15 = vpop.permute.xlu0 %553 }
 0x200   :  { %819 = vmatprep.subr.bf16.mxu1 %v287_v17 }
 0x201   :  { %820 = vmatpush3.bf16.msra.mxu1 %v287_v17 }
 0x202   :  { %821 = vmatprep.subr.bf16.mxu1 %v288_v16 }
 0x205   :  { %822 = vmatpush3.bf16.msra.mxu1 %v288_v16 }
 0x208   :  { %824 = vmatmul.mubr.msk.bf16.vlgmr.msra.gmra.mrb[4].mxu1 %vm357_vm3, %v914_v18 }
 0x209   :  { %827 = vmatprep.mubr.msk.bf16.mxu1 %vm357_vm3, %v915_v19  ;;  %v559_v19 = vpop.permute.xlu1 %558 }
 0x210   :  { %828 = vmatmul.mubr.msk.bf16.gmra.mrb[8].mxu1 %vm357_vm3, %v916_v20 }
 0x211   :  { %839 = vmatprep.mubr.msk.bf16.mxu1 %vm485_vm4, %v917_v21 }
 0x2db   :  { %v825_v26 = vpop.f32.mrb[4].mxu1 }
 0x2dc   :  { %v413_v27 = vadd.f32 %v825_v26, %v310_v24  ;;  %v404_v28 = vpop.f32.mrb[5].mxu1  ;;  %v612_v26 = vld [vmem:[%s1183_s1 + $0x50] sm:$0xf]  ;;  %s920_s1 = scalar_lea.vmem %s692_s29, 16 }
 0x2dd   :  { %v405_v30 = vadd.f32 %v404_v28, %v300_v22  ;;  %v826_v31 = vpop.f32.mrb[6].mxu1  ;;  %p921_p0 = scmp.ne.s32.totalorder %s692_s29, %s920_s1  ;;  %p926_p2 = scmp.lt.s32.totalorder %s924_s30, %s920_s1 }
 0x2de   :  { %v416_v32 = vadd.f32 %v826_v31, %v315_v25  ;;  %v407_v33 = vpop.f32.mrb[7].mxu1  ;;  %v437_v36 = vmax.f32 %v413_v27, 0.0  ;;  %v618_v27 = vpop.permute.xlu0 %617 }
 0x2df   :  { %v408_v35 = vadd.f32 %v407_v33, %v305_v23  ;;  %v435_v38 = vmax.f32 %v405_v30, 0.0  ;;  %p927_p3 = por %p926_p2, %p925_p1 }
 0x2e0   :  { %v438_v37 = vmax.f32 %v416_v32, 0.0 }
 0x2e1   :  { %v436_v39 = vmax.f32 %v408_v35, 0.0  ;;  %p928_p4 = pnand %p927_p3, %p921_p0 }
 0x2e2   :  { %v448_v40 = vpack.c.bf16 %v438_v37, %v437_v36 }
 0x2e3   :  { %v447_v42 = vpack.c.bf16 %v436_v39, %v435_v38  ;;  %v829_v43 = vpop.f32.mrb[8].mxu1 }
 0x2e4   :  { %v429_v44 = vadd.f32 %v829_v43, %v330_v41  ;;  %v420_v45 = vpop.f32.mrb[9].mxu1 }
 0x2e5   :  { %v421_v47 = vadd.f32 %v420_v45, %v320_v29  ;;  %v830_v48 = vpop.f32.mrb[10].mxu1  ;;  %831 = vmatprep.subr.bf16.mxu1 %v447_v42 }
 0x2e6   :  { %v432_v49 = vadd.f32 %v830_v48, %v335_v46  ;;  %v423_v50 = vpop.f32.mrb[11].mxu1  ;;  %832 = vmatpush3.bf16.msra.mxu1 %v447_v42  ;;  %v441_v52 = vmax.f32 %v429_v44, 0.0  ;;  %v681_v42 = vpop.permute.xlu0 %680 }
 0x2e7   :  { %v424_v51 = vadd.f32 %v423_v50, %v325_v34  ;;  %833 = vmatprep.subr.bf16.mxu1 %v448_v40  ;;  %v439_v54 = vmax.f32 %v421_v47, 0.0  ;;  %v669_v34 = vpop.permute.xlu1 %668 }
 0x2e8   :  { %v442_v53 = vmax.f32 %v432_v49, 0.0 }
 0x2e9   :  { %v440_v55 = vmax.f32 %v424_v51, 0.0 }
 0x2ea   :  { %v450_v56 = vpack.c.bf16 %v442_v53, %v441_v52  ;;  %834 = vmatpush3.bf16.msra.mxu1 %v448_v40 }
 0x2eb   :  { %v449_v57 = vpack.c.bf16 %v440_v55, %v439_v54 }
 0x2ed   :  { %835 = vmatprep.subr.bf16.mxu1 %v449_v57 }
 0x2ee   :  { %836 = vmatpush3.bf16.msra.mxu1 %v449_v57 }
 0x2ef   :  { %837 = vmatprep.subr.bf16.mxu1 %v450_v56 }
 0x2f2   :  { %838 = vmatpush3.bf16.msra.mxu1 %v450_v56 }
 0x2f3   :  { %843 = vmatprep.subr.bf16.mxu1 %v945_v59 }
 0x2f5   :  { %840 = vmatmul.mubr.msk.bf16.vlgmr.msra.gmra.mrb[12].mxu1 %vm485_vm4, %v918_v58 }
 0x2f6   :  { %847 = vmatprep.mubr.msk.bf16.mxu1 %vm946_vm5, %v945_v59 }
 0x3c8   :  { %v841_v63 = vpop.f32.mrb[12].mxu1 }
 0x3c9   :  { %v535_v0 = vadd.f32 %v841_v63, %v468_v62  ;;  %v526_v1 = vpop.f32.mrb[13].mxu1 }
 0x3ca   :  { %v527_v3 = vadd.f32 %v526_v1, %v458_v60  ;;  %v842_v4 = vpop.f32.mrb[14].mxu1 }
 0x3cb   :  { %v538_v5 = vadd.f32 %v842_v4, %v473_v2  ;;  %v529_v6 = vpop.f32.mrb[15].mxu1  ;;  %v543_v8 = vmax.f32 %v535_v0, 0.0 }
 0x3cc   :  { %v530_v7 = vadd.f32 %v529_v6, %v463_v61  ;;  %v541_v10 = vmax.f32 %v527_v3, 0.0 }
 0x3cd   :  { %v544_v9 = vmax.f32 %v538_v5, 0.0 }
 0x3ce   :  { %v542_v11 = vmax.f32 %v530_v7, 0.0 }
 0x3cf   :  { %v548_v12 = vpack.c.bf16 %v544_v9, %v543_v8 }
 0x3d0   :  { %v547_v13 = vpack.c.bf16 %v542_v11, %v541_v10 }
 0x3d2   :  { %844 = vmatpush3.bf16.msra.mxu1 %v547_v13 }
 0x3d3   :  { %845 = vmatprep.subr.bf16.mxu1 %v945_v59 }
 0x3d6   :  { %846 = vmatpush3.bf16.msra.mxu1 %v548_v12 }
 0x3d7   :  { %851 = vmatprep.subr.bf16.mxu1 %v945_v59 }
 0x3d9   :  { %848 = vmatmul.mubr.msk.bf16.vlgmr.msra.gmra.mrb[16].mxu1 %vm357_vm3, %v919_v14 }
 0x3da   :  { %853 = vmatprep.mubr.msk.bf16.mxu1 %vm946_vm5, %v945_v59 }
 0x4ac   :  { %v603_v16 = vpop.f32.mrb[16].mxu1 }
 0x4ad   :  { %v604_v17 = vadd.f32 %v603_v16, %v554_v15  ;;  %v849_v18 = vpop.f32.mrb[17].mxu1 }
 0x4ae   :  { %v606_v20 = vpop.f32.mrb[18].mxu1 }
 0x4af   :  { %v607_v21 = vadd.f32 %v606_v20, %v559_v19  ;;  %v850_v22 = vpop.f32.mrb[19].mxu1  ;;  %v610_v23 = vmax.f32 %v604_v17, 0.0 }
 0x4b1   :  { %v611_v24 = vmax.f32 %v607_v21, 0.0 }
 0x4b3   :  { %v613_v25 = vpack.c.bf16 %v611_v24, %v610_v23 }
 0x4b5   :  { %852 = vmatpush3.bf16.msra.mxu1 %v613_v25 }
 0x4b8   :  { %854 = vmatmul.mubr.msk.bf16.vlgmr.msra.gmra.mrb[20].mxu1 %vm219_vm2, %v612_v26 }
 0x58b   :  { %v657_v28 = vpop.f32.mrb[20].mxu1 }
 0x58c   :  { %v658_v29 = vadd.f32 %v657_v28, %v618_v27  ;;  %v855_v30 = vpop.f32.mrb[21].mxu1 }
 0x58d   :  { %v660_v31 = vpop.f32.mrb[22].mxu1 }
 0x58e   :  { %v663_v32 = vmax.f32 %v658_v29, 0.0  ;;  %v856_v33 = vpop.f32.mrb[23].mxu1 }
 0x590   :  { %v671_v35 = vmul.f32 %v669_v34, %v663_v32 }
 0x592   :  { %v672_v36 = vrot.slane %v671_v35, 4 }
 0x594   :  { %v673_v37 = vadd.f32 %v672_v36, %v671_v35 }
 0x596   :  { %v674_v38 = vrot.slane %v673_v37, 2 }
 0x598   :  { %v675_v39 = vadd.f32 %v674_v38, %v673_v37 }
 0x59a   :  { %v676_v40 = vrot.slane %v675_v39, 1 }
 0x59c   :  { %v677_v41 = vadd.f32 %v676_v40, %v675_v39 }
 0x59e   :  { %v683_v43 = vadd.f32 %v681_v42, %v677_v41 }
 0x5a0   :  { %684 = vst [vmem:[#allocation2] sm:$0x1] %v683_v43 }
 0x5a1   :  { %931 = shalt.err (!%p928_p4)
}
 0x5a2   :  { %s932_s6 = scalar_lea.hbm %s1185_s3, 16 }
 0x5a3   :  { %p933_p5 = scmp.ne.s32.totalorder %s1185_s3, %s932_s6  ;;  %p936_p6 = scmp.lt.u32.totalorder %s932_s6, %s1185_s3 }
 0x5a5   :  { %p938_p7 = pnand %p936_p6, %p933_p5 }
 0x5a7   :  { %941 = shalt.err (!%p938_p7)
}
 0x5a8   :  { %694 = dma.vmem_to_hbm [thread:$0]  %s692_s29, 16, %s1185_s3, [#allocation3]  }
 0x5a9   :  { %942 = dma.done.wait [#allocation3], 16  }
 0x5aa   :  { %943 = vsyncadd [#allocation3], 4294967280 }
 0x5ab   :  { %698 = vsyncpa [#allocation3], 1 }

</bundles_post_ra>
